<compile_context>
chip_gen: v7x
topology: tpu7x:2x2x1
jax: 0.10.0
libtpu: 0.0.40
codegen_flags: <defaults>
</compile_context>

<pallas_src>
import jax
import jax.numpy as jnp
from jax.experimental import pallas as pl
from jax.experimental.pallas import tpu as pltpu


def _tagged_input_kernel(x_ref, vsa_ref, o_ref):
    # x_ref  : (tm, R+1)  packed input rows, last column is ones
    # vsa_ref: (R+1, W)   rows 0..R-1 = kron(I_R, v); row R = tile(c, R)
    # o_ref  : (tm, W)    lane-dense output block
    o_ref[...] = jnp.dot(
        x_ref[...], vsa_ref[...], preferred_element_type=jnp.float32
    ).astype(o_ref.dtype)


def _round_up(a, m):
    return ((a + m - 1) // m) * m


def tagged_input(x, params, *, block_rows=None, out_dtype=jnp.float32):
    """x: (B, S) -> (B, S, H), matching TaggedInput.forward (Continuous input)."""
    B, S = x.shape
    H = params["b_e"].shape[0]
    N = B * S

    # ---- fold the whole module into out[n, :] = x[n] * v + c (tiny GEMVs) ----
    w_e = params["W_e"].reshape(H).astype(jnp.float32)     # Linear(1, H).weight
    b_e = params["b_e"].astype(jnp.float32)                # Linear(1, H).bias
    tag = params["tag"].reshape(H).astype(jnp.float32)     # Embedding(1, H).weight[0]
    W_p = params["W_p"].astype(jnp.float32)                # Linear(2H, H).weight (H, 2H)
    b_p = params["b_p"].astype(jnp.float32)

    wp_top = W_p[:, :H]                                    # acts on embed
    wp_bot = W_p[:, H:]                                    # acts on tag (constant)
    v = wp_top @ w_e                                       # (H,)
    c = wp_top @ b_e + wp_bot @ tag + b_p                  # (H,)

    # ---- lane-dense packing: view (N, H) output as (Nr, R*H), R*H >= 128 ----
    if H < 128 and 128 % H == 0:
        R = 128 // H
    else:
        R = 1  # sub-lane-dense fallback (masked vst) — correct, slower for H ∤ 128
    W = R * H

    N_pad = _round_up(N, R)                                # pad only to multiple of R
    Nr = N_pad // R

    x_flat = x.reshape(N).astype(jnp.float32)
    if N_pad != N:
        x_flat = jnp.pad(x_flat, (0, N_pad - N))
    x_packed = x_flat.reshape(Nr, R)
    # Augment with a ones column -> the bias `c` rides the same MXU matmul.
    x_aug = jnp.concatenate(
        [x_packed, jnp.ones((Nr, 1), dtype=jnp.float32)], axis=-1)      # (Nr, R+1)

    v_blocks = jnp.kron(jnp.eye(R, dtype=jnp.float32), v.reshape(1, H))  # (R, W)
    c_row = jnp.tile(c, R).reshape(1, W)                                 # (1, W)
    vsa = jnp.concatenate([v_blocks, c_row], axis=0)                     # (R+1, W)

    # ---- block sizing: budget out block + lane-padded x block, double-buffered ----
    if block_rows is None:
        # Per packed row in VMEM: output W lanes (f32) + x padded to 128 lanes (f32),
        # each double-buffered by the pipeline.
        bytes_per_row = 2 * 4 * (W + 128)
        budget = 12 * 1024 * 1024        # conservative: fits v7x's 32 MiB scoped VMEM
        block_rows = max(8, min(8192, (budget // bytes_per_row) // 8 * 8))

    if Nr <= 8:
        tm = Nr                          # single block, equal to full array dim
    else:
        # Guarantee >= 2 grid steps so v7x's two TensorCores both run.
        tm = max(8, min(block_rows, _round_up(pl.cdiv(Nr, 2), 8)))
    grid_steps = pl.cdiv(Nr, tm)         # ragged last block is masked by Pallas

    out_itemsize = jnp.dtype(out_dtype).itemsize

    out2 = pl.pallas_call(
        _tagged_input_kernel,
        out_shape=jax.ShapeDtypeStruct((Nr, W), out_dtype),
        grid_spec=pltpu.PrefetchScalarGridSpec(
            num_scalar_prefetch=0,
            grid=(grid_steps,),
            in_specs=[
                pl.BlockSpec((tm, R + 1), lambda i: (i, 0)),   # packed x (+ ones col)
                pl.BlockSpec((R + 1, W), lambda i: (0, 0)),    # folded weights (resident)
            ],
            out_specs=pl.BlockSpec((tm, W), lambda i: (i, 0)),
        ),
        compiler_params=pltpu.CompilerParams(
            dimension_semantics=("parallel",),
            vmem_limit_bytes=32 * 1024 * 1024,
        ),
        cost_estimate=pl.CostEstimate(
            flops=2 * Nr * (R + 1) * W,
            transcendentals=0,
            bytes_accessed=Nr * (R + 1) * 4 + Nr * W * out_itemsize + (R + 1) * W * 4,
        ),
    )(x_aug, vsa)

    out = out2.reshape(N_pad, H)
    if N_pad != N:                        # only when N % R != 0 (rare)
        out = out[:N]
    return out.reshape(B, S, H)


def reference(x, params):
    """Pure-JAX mirror of the original (un-folded) PyTorch forward."""
    H = params["b_e"].shape[0]
    embed = x[..., None].astype(jnp.float32) * params["W_e"].reshape(H) \
        + params["b_e"]                                       # (B, S, H)
    tag = jnp.broadcast_to(params["tag"].reshape(1, 1, H), embed.shape)
    cat = jnp.concatenate([embed, tag], axis=-1)              # (B, S, 2H)
    return cat @ params["W_p"].T + params["b_p"]


def _make_params(key, H):
    k1, k2, k3, k4, k5 = jax.random.split(key, 5)
    return {
        "W_e": jax.random.normal(k1, (H, 1), dtype=jnp.float32) * 0.1,      # Linear(1,H).weight
        "b_e": jax.random.normal(k2, (H,), dtype=jnp.float32) * 0.1,        # Linear(1,H).bias
        "tag": jax.random.normal(k3, (1, H), dtype=jnp.float32) * 0.1,      # Embedding(1,H).weight
        "W_p": jax.random.normal(k4, (H, 2 * H), dtype=jnp.float32) * 0.1,  # Linear(2H,H).weight
        "b_p": jax.random.normal(k5, (H,), dtype=jnp.float32) * 0.1,        # Linear(2H,H).bias
    }


if __name__ == "__main__":
    key = jax.random.PRNGKey(0)
    kx, kp, kx2 = jax.random.split(key, 3)

    # --- small shape consistent with the module: batch=2, seq=8, hidden=32 ---
    B, S, H = 2, 8, 32
    params = _make_params(kp, H)
    x = jax.random.normal(kx, (B, S), dtype=jnp.float32)

    out = tagged_input(x, params)
    out = jax.block_until_ready(out)
    ref = reference(x, params)
    assert out.shape == (B, S, H)
    assert jnp.allclose(out, ref, atol=1e-5, rtol=1e-5)

    # --- second shape: exercises >=2 grid steps, ragged last block, N % R != 0 ---
    B2, S2 = 3, 50
    x2 = jax.random.normal(kx2, (B2, S2), dtype=jnp.float32)
    out2 = jax.block_until_ready(tagged_input(x2, params))
    ref2 = reference(x2, params)
    assert out2.shape == (B2, S2, H)
    assert jnp.allclose(out2, ref2, atol=1e-5, rtol=1e-5)

    print("KERNEL_OK")
</pallas_src>

<mosaic_0001>
module attributes {stable_mosaic.version = 11 : i64} {
  func.func @_tagged_input_kernel(%arg0: i32, %arg1: memref<4x5xf32, #tpu.memory_space<vmem>>, %arg2: memref<5x128xf32, #tpu.memory_space<vmem>>, %arg3: memref<4x128xf32, #tpu.memory_space<vmem>>) attributes {dimension_semantics = [#tpu.dimension_semantics<parallel>], iteration_bounds = array<i64: 1>, scalar_prefetch = 0 : i64, scratch_operands = 0 : i64, tpu.core_type = #tpu.core_type<tc>, window_params = [{transform_indices = @transform_0, window_bounds = array<i64: 4, 5>}, {pipeline_mode = #tpu.pipeline_mode<synchronous>, transform_indices = @transform_1, window_bounds = array<i64: 5, 128>}, {transform_indices = @transform_2, window_bounds = array<i64: 4, 128>}]} {
    %c0 = arith.constant 0 : index
    %c0_0 = arith.constant 0 : index
    %0 = vector.load %arg1[%c0, %c0_0] : memref<4x5xf32, #tpu.memory_space<vmem>>, vector<4x5xf32>
    %c0_1 = arith.constant 0 : index
    %c0_2 = arith.constant 0 : index
    %1 = vector.load %arg2[%c0_1, %c0_2] : memref<5x128xf32, #tpu.memory_space<vmem>>, vector<5x128xf32>
    %cst = arith.constant dense<0.000000e+00> : vector<4x128xf32>
    %2 = tpu.matmul %0, %1, %cst {dimension_numbers = #tpu.dot_dimension_numbers<[1], [0], [0], [1], [0, 0, 1, 1], [], []>} : vector<4x5xf32>, vector<5x128xf32>, vector<4x128xf32> -> vector<4x128xf32>
    %c0_3 = arith.constant 0 : index
    %c0_4 = arith.constant 0 : index
    %3 = vector.load %arg3[%c0_3, %c0_4] : memref<4x128xf32, #tpu.memory_space<vmem>>, vector<4x128xf32>
    tpu.vector_store %arg3[%c0_3, %c0_4], %2 {strides = array<i32>} : memref<4x128xf32, #tpu.memory_space<vmem>>, vector<4x128xf32>,
    return
  }
  func.func @transform_0(%arg0: i32) -> (i32, i32) {
    %c0_i32 = arith.constant 0 : i32
    %c0_i32_0 = arith.constant 0 : i32
    return %arg0, %c0_i32 : i32, i32
  }
  func.func @transform_1(%arg0: i32) -> (i32, i32) {
    %c0_i32 = arith.constant 0 : i32
    %c0_i32_0 = arith.constant 0 : i32
    %c0_i32_1 = arith.constant 0 : i32
    return %c0_i32, %c0_i32_0 : i32, i32
  }
  func.func @transform_2(%arg0: i32) -> (i32, i32) {
    %c0_i32 = arith.constant 0 : i32
    %c0_i32_0 = arith.constant 0 : i32
    return %arg0, %c0_i32 : i32, i32
  }
}

</mosaic_0001>

<bundles_post_ra>
// kernel: tpu_custom_call.1
= control target key start
LH: loop header
LB: loop body
LE: loop exit
PB: predicated region body
PF: predicated region fallthrough
CT: control target
= control target key end

     0   :  { %7 = vsyncpa [#allocation3], 0  ;;  %s275_s0 = inlined_call_operand.hbm [shape: f32[4,5], index: 0, kind: input, shape index: {}]   ;;  %s276_s1 = inlined_call_operand.hbm [shape: f32[5,128], index: 1, kind: input, shape index: {}]   ;;  %s277_s2 = inlined_call_operand.hbm [shape: f32[4,128], index: 2, kind: output, shape index: {}]  }
   0x1   :  { %8 = vsyncpa [#allocation6], 0 }
   0x2   :  { %9 = vsyncpa [#allocation4], 0  ;;  %s219_s9 = smov [#allocation2]   ;;  %s220_s11 = smov [#allocation5]  }
   0x3   :  { %s16_s10 = sshll.u32 %s219_s9, 4  ;;  %s26_s12 = sshll.u32 %s220_s11, 4  ;;  %s17_s10 = int_to_ptr.vmem [resolvable:$true] %s16_s10  ;;  %s27_s12 = int_to_ptr.vmem [resolvable:$true] %s26_s12 }
   0x4   :  { %s147_s15 = scalar_lea.hbm %s275_s0, 64 }
   0x5   :  { %p148_p0 = scmp.ne.s32.totalorder %s275_s0, %s147_s15  ;;  %p151_p1 = scmp.lt.u32.totalorder %s147_s15, %s275_s0 }
   0x7   :  { %p153_p2 = pnand %p151_p1, %p148_p0 }
   0x9   :  { %156 = shalt.err (!%p153_p2)
}
   0xa   :  { %s157_s20 = scalar_lea.vmem %s17_s10, 64  ;;  %p162_p4 = scmp.lt.s32.totalorder %s17_s10, %s17_s10 }
   0xb   :  { %p158_p3 = scmp.ne.s32.totalorder %s17_s10, %s157_s20  ;;  %p163_p5 = scmp.lt.s32.totalorder %s157_s20, %s157_s20 }
   0xd   :  { %p164_p6 = por %p163_p5, %p162_p4 }
   0xf   :  { %p165_p7 = pnand %p164_p6, %p158_p3 }
  0x11   :  { %168 = shalt.err (!%p165_p7)
}
  0x12   :  { %19 = dma.hbm_to_vmem [thread:$0]  %s275_s0, 64, %s17_s10, [#allocation3]  }
  0x13   :  { %s169_s25 = scalar_lea.hbm %s276_s1, 128 }
  0x14   :  { %p170_p8 = scmp.ne.s32.totalorder %s276_s1, %s169_s25  ;;  %p173_p9 = scmp.lt.u32.totalorder %s169_s25, %s276_s1 }
  0x16   :  { %p175_p10 = pnand %p173_p9, %p170_p8 }
  0x18   :  { %178 = shalt.err (!%p175_p10)
}
  0x19   :  { %s179_s30 = scalar_lea.vmem %s27_s12, 128  ;;  %p184_p12 = scmp.lt.s32.totalorder %s27_s12, %s27_s12 }
  0x1a   :  { %p180_p11 = scmp.ne.s32.totalorder %s27_s12, %s179_s30  ;;  %p185_p13 = scmp.lt.s32.totalorder %s179_s30, %s179_s30 }
  0x1c   :  { %p186_p0 = por %p185_p13, %p184_p12 }
  0x1e   :  { %p187_p1 = pnand %p186_p0, %p180_p11 }
  0x20   :  { %190 = shalt.err (!%p187_p1)
}
  0x21   :  { %29 = dma.hbm_to_vmem [thread:$0]  %s276_s1, 128, %s27_s12, [#allocation6]  }
  0x22   :  { %213 = dma.done.wait [#allocation3], 64  }
  0x23   :  { %214 = vsyncadd [#allocation3], 4294967232 }
  0x24   :  { %215 = dma.done.wait [#allocation6], 128  }
  0x25   :  { %216 = vsyncadd [#allocation6], 4294967168  ;;  %v221_v0 = vmov 0.0   ;;  %vm222_vm0 = vmmov 0   ;;  %vm42_vm1 = vcmask 1044480   ;;  %vm38_vm2 = vcmask 39936  }
  0x26   :  { %137 = vmatprep.subr.mxu0 %v221_v0  ;;  %139 = vmatprep.mubr.msk.f32.mxu0 %vm222_vm0, %v221_v0  ;;  %v37_v1 = vld [vmem:[#allocation5] sm:$0x1f]  ;;  %v36_v2 = vld [vmem:[#allocation2] sm:$0xf]  ;;  %s223_s4 = smov [#allocation7]  }
  0x27   :  { %138 = vmatpush3.msk.msra.mxu0 %vm42_vm1, %v37_v1  ;;  %s123_s5 = sshll.u32 %s223_s4, 4  ;;  %s124_s5 = int_to_ptr.vmem [resolvable:$true] %s123_s5 }
  0x28   :  { %140 = vmatmul.mubr.msk.f32.vlgmr.msra.gmra.mrb[0].mxu0 %vm38_vm2, %v36_v2  ;;  %s191_s1 = scalar_lea.vmem %s124_s5, 64  ;;  %p196_p3 = scmp.lt.s32.totalorder %s124_s5, %s124_s5 }
  0x29   :  { %p192_p2 = scmp.ne.s32.totalorder %s124_s5, %s191_s1  ;;  %p197_p4 = scmp.lt.s32.totalorder %s191_s1, %s191_s1 }
  0x2b   :  { %p198_p5 = por %p197_p4, %p196_p3 }
  0x2d   :  { %p199_p6 = pnand %p198_p5, %p192_p2 }
  0xfb   :  { %v112_v3 = vpop.f32.mrb[0].mxu0 }
  0xfc   :  { %116 = vst [vmem:[#allocation7] sm:$0xf] %v112_v3  ;;  %v141_v4 = vpop.f32.mrb[1].mxu0 }
  0xfd   :  { %202 = shalt.err (!%p199_p6)
}
  0xfe   :  { %s203_s8 = scalar_lea.hbm %s277_s2, 64 }
  0xff   :  { %p204_p7 = scmp.ne.s32.totalorder %s277_s2, %s203_s8  ;;  %p207_p8 = scmp.lt.u32.totalorder %s203_s8, %s277_s2 }
 0x101   :  { %p209_p9 = pnand %p207_p8, %p204_p7 }
 0x103   :  { %212 = shalt.err (!%p209_p9)
}
 0x104   :  { %126 = dma.vmem_to_hbm [thread:$0]  %s124_s5, 64, %s277_s2, [#allocation4]  }
 0x105   :  { %217 = dma.done.wait [#allocation4], 64  }
 0x106   :  { %218 = vsyncadd [#allocation4], 4294967232 }
 0x107   :  { %130 = vsyncpa [#allocation3], 1 }
 0x108   :  { %131 = vsyncpa [#allocation6], 1 }
 0x109   :  { %132 = vsyncpa [#allocation4], 1 }

</bundles_post_ra>
